<compile_context>
chip_gen: v7x
topology: tpu7x:2x2x1
jax: 0.10.0
libtpu: 0.0.40
codegen_flags: <defaults>
</compile_context>

<pallas_src>
import jax
import jax.numpy as jnp
import numpy as np
from jax.experimental import pallas as pl
from jax.experimental.pallas import tpu as pltpu  # noqa: F401  (TPU backend namespace)


# ----------------------------- Pallas kernel ------------------------------ #
def _identity_kernel(x_ref, o_ref):
    # Whole-array VMEM->VMEM copy; the reference forward() is identity.
    o_ref[...] = x_ref[...]


def kim_cnn_forward(x, params=None):
    """Faithful forward pass of the reference KimCNN: identity on x.

    `params` is accepted only to mirror the module's __init__; the reference
    forward() never touches any layer, so it is intentionally unused.
    """
    del params  # unused by the reference forward()
    return pl.pallas_call(
        _identity_kernel,
        out_shape=jax.ShapeDtypeStruct(x.shape, x.dtype),
        # No grid / no BlockSpecs: the full (tiny) array is a single block.
    )(x)


# jit'd wrapper so the call folds cleanly into any surrounding graph.
kim_cnn_forward_jit = jax.jit(kim_cnn_forward)


# ---------------------------------- main ----------------------------------- #
if __name__ == "__main__":
    vocab_size = 100
    batch, seq_len = 2, 8

    key = jax.random.PRNGKey(0)
    # x: [batch, seq_len] int32 token ids (the layout an Embedding-based
    # Kim-CNN would consume).
    x = jax.random.randint(key, (batch, seq_len), 0, vocab_size, dtype=jnp.int32)
    x_host = np.asarray(jax.device_get(x))

    out = kim_cnn_forward_jit(x)
    out = jax.block_until_ready(out)

    # Reference forward is identity: output must equal input exactly.
    assert out.shape == x_host.shape and out.dtype == x_host.dtype
    assert np.array_equal(np.asarray(jax.device_get(out)), x_host)

    print("KERNEL_OK")
</pallas_src>

<mosaic_0001>
module attributes {stable_mosaic.version = 11 : i64} {
  func.func @_identity_kernel(%arg0: memref<2x8xi32, #tpu.memory_space<vmem>>, %arg1: memref<2x8xi32, #tpu.memory_space<vmem>>) attributes {dimension_semantics = [], scalar_prefetch = 0 : i64, scratch_operands = 0 : i64, tpu.core_type = #tpu.core_type<tc>} {
    %c0 = arith.constant 0 : index
    %c0_0 = arith.constant 0 : index
    %0 = vector.load %arg0[%c0, %c0_0] : memref<2x8xi32, #tpu.memory_space<vmem>>, vector<2x8xi32>
    %c0_1 = arith.constant 0 : index
    %c0_2 = arith.constant 0 : index
    %1 = vector.load %arg1[%c0_1, %c0_2] : memref<2x8xi32, #tpu.memory_space<vmem>>, vector<2x8xi32>
    tpu.vector_store %arg1[%c0_1, %c0_2], %0 {strides = array<i32>} : memref<2x8xi32, #tpu.memory_space<vmem>>, vector<2x8xi32>,
    return
  }
}

</mosaic_0001>

<bundles_post_ra>
// kernel: kim_cnn_forward.1
= control target key start
LH: loop header
LB: loop body
LE: loop exit
PB: predicated region body
PF: predicated region fallthrough
CT: control target
= control target key end

     0   :  { %6 = vsyncpa [#allocation3], 0  ;;  %s125_s0 = inlined_call_operand.hbm [shape: s32[2,8], index: 0, kind: input, shape index: {}]   ;;  %s126_s1 = inlined_call_operand.hbm [shape: s32[2,8], index: 1, kind: output, shape index: {}]  }
   0x1   :  { %7 = vsyncpa [#allocation4], 0  ;;  %s89_s6 = smov [#allocation2]   ;;  %s41_s10 = scalar_lea.hbm %s125_s0, 32 }
   0x2   :  { %s14_s7 = sshll.u32 %s89_s6, 4  ;;  %p42_p0 = scmp.ne.s32.totalorder %s125_s0, %s41_s10  ;;  %s15_s7 = int_to_ptr.vmem [resolvable:$true] %s14_s7 }
   0x3   :  { %p45_p1 = scmp.lt.u32.totalorder %s41_s10, %s125_s0 }
   0x5   :  { %p47_p2 = pnand %p45_p1, %p42_p0 }
   0x7   :  { %50 = shalt.err (!%p47_p2)
}
   0x8   :  { %s51_s15 = scalar_lea.vmem %s15_s7, 32  ;;  %p56_p4 = scmp.lt.s32.totalorder %s15_s7, %s15_s7 }
   0x9   :  { %p52_p3 = scmp.ne.s32.totalorder %s15_s7, %s51_s15  ;;  %p57_p5 = scmp.lt.s32.totalorder %s51_s15, %s51_s15 }
   0xb   :  { %p58_p6 = por %p57_p5, %p56_p4 }
   0xd   :  { %p59_p7 = pnand %p58_p6, %p52_p3 }
   0xf   :  { %62 = shalt.err (!%p59_p7)
}
  0x10   :  { %17 = dma.hbm_to_vmem [thread:$0]  %s125_s0, 32, %s15_s7, [#allocation3]  }
  0x11   :  { %85 = dma.done.wait [#allocation3], 32  }
  0x12   :  { %86 = vsyncadd [#allocation3], 4294967264  ;;  %s90_s18 = smov [#allocation5]   ;;  %vm22_vm0 = vcmask 58368   ;;  %v21_v0 = vld [vmem:[#allocation2] sm:$0x3] }
  0x13   :  { %s30_s19 = sshll.u32 %s90_s18, 4  ;;  %23 = vst.msk [vmem:[#allocation5] sm:$0x3] %vm22_vm0, %v21_v0  ;;  %s31_s19 = int_to_ptr.vmem [resolvable:$true] %s30_s19 }
  0x14   :  { %s63_s20 = scalar_lea.vmem %s31_s19, 32  ;;  %p68_p9 = scmp.lt.s32.totalorder %s31_s19, %s31_s19 }
  0x15   :  { %p64_p8 = scmp.ne.s32.totalorder %s31_s19, %s63_s20  ;;  %p69_p10 = scmp.lt.s32.totalorder %s63_s20, %s63_s20 }
  0x17   :  { %p70_p11 = por %p69_p10, %p68_p9 }
  0x19   :  { %p71_p12 = pnand %p70_p11, %p64_p8 }
  0x1b   :  { %74 = shalt.err (!%p71_p12)
}
  0x1c   :  { %s75_s23 = scalar_lea.hbm %s126_s1, 32 }
  0x1d   :  { %p76_p13 = scmp.ne.s32.totalorder %s126_s1, %s75_s23  ;;  %p79_p0 = scmp.lt.u32.totalorder %s75_s23, %s126_s1 }
  0x1f   :  { %p81_p1 = pnand %p79_p0, %p76_p13 }
  0x21   :  { %84 = shalt.err (!%p81_p1)
}
  0x22   :  { %33 = dma.vmem_to_hbm [thread:$0]  %s31_s19, 32, %s126_s1, [#allocation4]  }
  0x23   :  { %87 = dma.done.wait [#allocation4], 32  }
  0x24   :  { %88 = vsyncadd [#allocation4], 4294967264 }
  0x25   :  { %37 = vsyncpa [#allocation3], 1 }
  0x26   :  { %38 = vsyncpa [#allocation4], 1 }

</bundles_post_ra>
